<compile_context>
chip_gen: v7x
topology: tpu7x:2x2x1
jax: 0.10.0
libtpu: 0.0.40
codegen_flags: <defaults>
</compile_context>

<pallas_src>
import functools
import math

import jax
import jax.numpy as jnp
from jax.experimental import pallas as pl
from jax.experimental.pallas import tpu as pltpu

_VMEM_LIMIT = 32 * 1024 * 1024  # explicit scoped-VMEM budget; safe on v5e/v6e/v7x


def _row_tile(m):
    """Largest row tile (multiple of 8, <=512) that evenly divides m."""
    for t in (512, 256, 128, 64, 32, 16, 8):
        if m % t == 0:
            return t
    return m  # tiny / ragged fallback: full slab


# ----------------------------- Pallas kernels ------------------------------

def _linear_kernel(x_ref, w_ref, b_ref, o_ref, *, relu):
    # bf16 MXU inputs, f32 accumulation + f32 epilogue.
    y = jnp.dot(x_ref[...].astype(jnp.bfloat16), w_ref[...],
                preferred_element_type=jnp.float32)
    y = y + b_ref[...]
    if relu:
        y = jnp.maximum(y, 0.0)
    o_ref[...] = y


def linear(x, w, b, relu=False):
    """y = x @ w + b (optionally ReLU). x: (M,K) f32, w: (K,N) bf16, b: (N,) f32."""
    M, K = x.shape
    N = w.shape[1]
    tm = _row_tile(M)
    return pl.pallas_call(
        functools.partial(_linear_kernel, relu=relu),
        out_shape=jax.ShapeDtypeStruct((M, N), jnp.float32),
        grid=(M // tm,),
        in_specs=[
            pl.BlockSpec((tm, K), lambda i: (i, 0)),
            pl.BlockSpec((K, N), lambda i: (0, 0)),
            pl.BlockSpec((1, N), lambda i: (0, 0)),
        ],
        out_specs=pl.BlockSpec((tm, N), lambda i: (i, 0)),
        compiler_params=pltpu.CompilerParams(
            dimension_semantics=("parallel",), vmem_limit_bytes=_VMEM_LIMIT),
    )(x, w, b.reshape(1, N))


def _linear_res_ln_kernel(x_ref, w_ref, b_ref, r_ref, g_ref, bt_ref, o_ref, *, relu):
    y = jnp.dot(x_ref[...].astype(jnp.bfloat16), w_ref[...],
                preferred_element_type=jnp.float32)
    y = y + b_ref[...]
    if relu:
        y = jnp.maximum(y, 0.0)
    h = r_ref[...] + y                                    # residual add
    mean = jnp.mean(h, axis=-1, keepdims=True)
    var = jnp.mean(jnp.square(h - mean), axis=-1, keepdims=True)
    o_ref[...] = (h - mean) * jax.lax.rsqrt(var + 1e-5) * g_ref[...] + bt_ref[...]


def linear_res_ln(x, w, b, residual, gamma, beta, relu=False):
    """LayerNorm(residual + [ReLU](x @ w + b)) fused into a single kernel."""
    M, K = x.shape
    N = w.shape[1]
    tm = _row_tile(M)
    return pl.pallas_call(
        functools.partial(_linear_res_ln_kernel, relu=relu),
        out_shape=jax.ShapeDtypeStruct((M, N), jnp.float32),
        grid=(M // tm,),
        in_specs=[
            pl.BlockSpec((tm, K), lambda i: (i, 0)),
            pl.BlockSpec((K, N), lambda i: (0, 0)),
            pl.BlockSpec((1, N), lambda i: (0, 0)),
            pl.BlockSpec((tm, N), lambda i: (i, 0)),
            pl.BlockSpec((1, N), lambda i: (0, 0)),
            pl.BlockSpec((1, N), lambda i: (0, 0)),
        ],
        out_specs=pl.BlockSpec((tm, N), lambda i: (i, 0)),
        compiler_params=pltpu.CompilerParams(
            dimension_semantics=("parallel",), vmem_limit_bytes=_VMEM_LIMIT),
    )(x, w, b.reshape(1, N), residual, gamma.reshape(1, N), beta.reshape(1, N))


def _attention_kernel(wd_ref, bd_ref, qkv_ref, pad_ref, o_ref, *,
                      n_heads, d_key, d_val, causal, max_steps):
    T = qkv_ref.shape[1]
    qkv = qkv_ref[0]                               # (T, 2*H*dk + H*dv) f32, lane-dense
    dq = n_heads * d_key
    q = qkv[:, :dq]
    k = qkv[:, dq:2 * dq]
    v = qkv[:, 2 * dq:]

    # Additive mask / rel-pos bias built on the VPU (no (B*H,T,T) HBM tensor).
    row = jax.lax.broadcasted_iota(jnp.int32, (T, T), 0)
    col = jax.lax.broadcasted_iota(jnp.int32, (T, T), 1)
    dist = jnp.clip((col - row).astype(jnp.float32),
                    -float(max_steps), float(max_steps)) / float(max_steps)
    base = pad_ref[0]                              # (1, T) additive key-padding bias
    if causal:
        base = base + jnp.where(col > row, -1e9, 0.0)

    scale = 1.0 / math.sqrt(d_key)
    outs = []
    for h in range(n_heads):
        qh = q[:, h * d_key:(h + 1) * d_key].astype(jnp.bfloat16)
        kh = k[:, h * d_key:(h + 1) * d_key].astype(jnp.bfloat16)
        vh = v[:, h * d_val:(h + 1) * d_val].astype(jnp.bfloat16)
        s = jax.lax.dot_general(qh, kh, (((1,), (1,)), ((), ())),
                                preferred_element_type=jnp.float32)
        s = s * scale + base + (wd_ref[h] * dist + bd_ref[h])   # per-head RPE from SMEM scalars
        m = jnp.max(s, axis=-1, keepdims=True)
        p = jnp.exp(s - m)
        p = p * pl.reciprocal(jnp.sum(p, axis=-1, keepdims=True), approx=True)
        outs.append(jnp.dot(p.astype(jnp.bfloat16), vh,
                            preferred_element_type=jnp.float32))
    o_ref[0] = jnp.concatenate(outs, axis=-1)      # one lane-dense (T, H*dv) store


def attention(qkv, pad_bias, w_dist, b_dist, *, n_heads, d_key, d_val,
              causal, max_steps):
    """qkv: (B, T, 2*H*d_key + H*d_val) f32, pad_bias: (B, 1, T) additive f32."""
    B, T, d_tot = qkv.shape
    dv_total = n_heads * d_val
    kernel = functools.partial(_attention_kernel, n_heads=n_heads, d_key=d_key,
                               d_val=d_val, causal=causal, max_steps=max_steps)
    return pl.pallas_call(
        kernel,
        out_shape=jax.ShapeDtypeStruct((B, T, dv_total), jnp.float32),
        grid_spec=pltpu.PrefetchScalarGridSpec(
            num_scalar_prefetch=2,          # w_dist, b_dist -> SMEM
            grid=(B,),
            in_specs=[
                pl.BlockSpec((1, T, d_tot), lambda b, wd, bd: (b, 0, 0)),
                pl.BlockSpec((1, 1, T), lambda b, wd, bd: (b, 0, 0)),
            ],
            out_specs=pl.BlockSpec((1, T, dv_total), lambda b, wd, bd: (b, 0, 0)),
        ),
        compiler_params=pltpu.CompilerParams(
            dimension_semantics=("parallel",), vmem_limit_bytes=_VMEM_LIMIT),
    )(w_dist, b_dist, qkv, pad_bias)


# ------------------------- parameters (deterministic) ----------------------

def _xavier(key, shape):
    bound = math.sqrt(6.0 / (shape[0] + shape[1]))
    return jax.random.uniform(key, shape, jnp.float32, -bound, bound)


def init_params(key, in_channels, out_channels, d_model, d_key, n_blocks, n_heads):
    d_val = d_model // n_heads
    keys = jax.random.split(key, 2 + n_blocks)
    params = {
        "w_in": _xavier(keys[0], (in_channels, d_model)).astype(jnp.bfloat16),
        "b_in": jnp.zeros((d_model,), jnp.float32),
        "w_out": _xavier(keys[1], (d_model, out_channels)).astype(jnp.bfloat16),
        "b_out": jnp.zeros((out_channels,), jnp.float32),
        "layers": [],
    }
    for blk in range(n_blocks):
        lk = jax.random.split(keys[2 + blk], 6)
        wq = _xavier(lk[0], (d_model, n_heads * d_key))
        wk = _xavier(lk[1], (d_model, n_heads * d_key))
        wv = _xavier(lk[2], (d_model, n_heads * d_val))
        params["layers"].append({
            # fused QKV projection weight: one matmul instead of three
            "w_qkv": jnp.concatenate([wq, wk, wv], axis=1).astype(jnp.bfloat16),
            "b_qkv": jnp.zeros((2 * n_heads * d_key + n_heads * d_val,), jnp.float32),
            "wo": _xavier(lk[3], (n_heads * d_val, d_model)).astype(jnp.bfloat16),
            "bo": jnp.zeros((d_model,), jnp.float32),
            # relative positional encoding: per-head affine on signed distances
            "w_dist": jax.random.uniform(lk[4], (n_heads,), jnp.float32, -0.1, 0.1),
            "b_dist": jnp.zeros((n_heads,), jnp.float32),
            # feed-forward Conv1d(kernel=conv_size); conv_size=1 -> plain linear
            "wff": _xavier(lk[5], (d_model, d_model)).astype(jnp.bfloat16),
            "bff": jnp.zeros((d_model,), jnp.float32),
            "ln1_g": jnp.ones((d_model,), jnp.float32),
            "ln1_b": jnp.zeros((d_model,), jnp.float32),
            "ln2_g": jnp.ones((d_model,), jnp.float32),
            "ln2_b": jnp.zeros((d_model,), jnp.float32),
        })
    return params


# ------------------------------- forward pass ------------------------------

def transformer_forward(params, x, *, d_model, d_key, n_heads, max_steps=32,
                        causal=True, padding_value=0.0, conv_size=1,
                        return_last=True):
    # TODO(synk): causal-padded conv (conv_size > 1) feed-forward not implemented.
    assert conv_size == 1
    x = x[:, -max_steps:]
    B, T, F = x.shape
    H = n_heads
    d_val = d_model // n_heads

    # Key-padding mask as additive bias (B, 1, T); causal mask + rel-pos bias are
    # built in-kernel from iota.  (Fully-padded query rows keep a uniform softmax,
    # matching the reference behaviour of masked-only attention rows.)
    is_pad = jnp.all(x == padding_value, axis=2)
    pad_bias = jnp.where(is_pad, -1e9, 0.0).astype(jnp.float32).reshape(B, 1, T)

    # input encoding: Conv1d(in_channels -> d_model, kernel=1) == per-step linear
    y = linear(x.reshape(B * T, F), params["w_in"], params["b_in"])      # (B*T, d_model)

    for layer in params["layers"]:
        qkv = linear(y, layer["w_qkv"], layer["b_qkv"])                  # fused QKV matmul
        attn = attention(qkv.reshape(B, T, -1), pad_bias,
                         layer["w_dist"], layer["b_dist"],
                         n_heads=H, d_key=d_key, d_val=d_val,
                         causal=causal, max_steps=max_steps)             # (B, T, H*d_val)
        # output projection + residual + LayerNorm, fused epilogue
        h = linear_res_ln(attn.reshape(B * T, H * d_val), layer["wo"], layer["bo"],
                          residual=y, gamma=layer["ln1_g"], beta=layer["ln1_b"])
        # feed-forward (ReLU) + residual + LayerNorm, fused epilogue
        y = linear_res_ln(h, layer["wff"], layer["bff"],
                          residual=h, gamma=layer["ln2_g"], beta=layer["ln2_b"],
                          relu=True)

    if return_last:
        y_last = y.reshape(B, T, d_model)[:, -1]                         # (B, d_model)
        return linear(y_last, params["w_out"], params["b_out"])          # (B, out_ch)
    out = linear(y, params["w_out"], params["b_out"])
    return out.reshape(B, T, -1)


# ----------------------------------- main -----------------------------------

if __name__ == "__main__":
    B, T, IN_CH = 2, 8, 4
    OUT_CH, D_MODEL, D_KEY, N_HEADS, N_BLOCKS = 3, 32, 16, 2, 2

    key = jax.random.PRNGKey(0)
    kp, kx = jax.random.split(key)
    params = init_params(kp, IN_CH, OUT_CH, D_MODEL, D_KEY, N_BLOCKS, N_HEADS)
    x = jax.random.normal(kx, (B, T, IN_CH), jnp.float32)

    out = transformer_forward(params, x, d_model=D_MODEL, d_key=D_KEY,
                              n_heads=N_HEADS, max_steps=32, causal=True,
                              conv_size=1, return_last=True)
    out = jax.block_until_ready(out)
    assert out.shape == (B, OUT_CH), out.shape
    assert bool(jnp.all(jnp.isfinite(out)))
    print("KERNEL_OK")
</pallas_src>

<mosaic_0001>
module attributes {stable_mosaic.version = 11 : i64} {
  func.func @_linear_kernel(%arg0: i32, %arg1: memref<16x4xf32, #tpu.memory_space<vmem>>, %arg2: memref<4x32xbf16, #tpu.memory_space<vmem>>, %arg3: memref<1x32xf32, #tpu.memory_space<vmem>>, %arg4: memref<16x32xf32, #tpu.memory_space<vmem>>) attributes {dimension_semantics = [#tpu.dimension_semantics<parallel>], iteration_bounds = array<i64: 1>, scalar_prefetch = 0 : i64, scratch_operands = 0 : i64, tpu.core_type = #tpu.core_type<tc>, window_params = [{transform_indices = @transform_0, window_bounds = array<i64: 16, 4>}, {pipeline_mode = #tpu.pipeline_mode<synchronous>, transform_indices = @transform_1, window_bounds = array<i64: 4, 32>}, {pipeline_mode = #tpu.pipeline_mode<synchronous>, transform_indices = @transform_2, window_bounds = array<i64: 1, 32>}, {transform_indices = @transform_3, window_bounds = array<i64: 16, 32>}]} {
    %c0 = arith.constant 0 : index
    %c0_0 = arith.constant 0 : index
    %0 = vector.load %arg1[%c0, %c0_0] : memref<16x4xf32, #tpu.memory_space<vmem>>, vector<16x4xf32>
    %1 = arith.truncf %0 : vector<16x4xf32> to vector<16x4xbf16>
    %c0_1 = arith.constant 0 : index
    %c0_2 = arith.constant 0 : index
    %2 = vector.load %arg2[%c0_1, %c0_2] : memref<4x32xbf16, #tpu.memory_space<vmem>>, vector<4x32xbf16>
    %cst = arith.constant dense<0.000000e+00> : vector<16x32xf32>
    %3 = tpu.matmul %1, %2, %cst {dimension_numbers = #tpu.dot_dimension_numbers<[1], [0], [0], [1], [0, 0, 1, 1], [], []>} : vector<16x4xbf16>, vector<4x32xbf16>, vector<16x32xf32> -> vector<16x32xf32>
    %c0_3 = arith.constant 0 : index
    %c0_4 = arith.constant 0 : index
    %4 = vector.load %arg3[%c0_3, %c0_4] : memref<1x32xf32, #tpu.memory_space<vmem>>, vector<1x32xf32>
    %5 = vector.broadcast %4 : vector<1x32xf32> to vector<16x32xf32>
    %6 = arith.addf %3, %5 : vector<16x32xf32>
    %c0_5 = arith.constant 0 : index
    %c0_6 = arith.constant 0 : index
    %7 = vector.load %arg4[%c0_5, %c0_6] : memref<16x32xf32, #tpu.memory_space<vmem>>, vector<16x32xf32>
    tpu.vector_store %arg4[%c0_5, %c0_6], %6 {strides = array<i32>} : memref<16x32xf32, #tpu.memory_space<vmem>>, vector<16x32xf32>,
    return
  }
  func.func @transform_0(%arg0: i32) -> (i32, i32) {
    %c0_i32 = arith.constant 0 : i32
    %c0_i32_0 = arith.constant 0 : i32
    return %arg0, %c0_i32 : i32, i32
  }
  func.func @transform_1(%arg0: i32) -> (i32, i32) {
    %c0_i32 = arith.constant 0 : i32
    %c0_i32_0 = arith.constant 0 : i32
    %c0_i32_1 = arith.constant 0 : i32
    return %c0_i32, %c0_i32_0 : i32, i32
  }
  func.func @transform_2(%arg0: i32) -> (i32, i32) {
    %c0_i32 = arith.constant 0 : i32
    %c0_i32_0 = arith.constant 0 : i32
    %c0_i32_1 = arith.constant 0 : i32
    return %c0_i32, %c0_i32_0 : i32, i32
  }
  func.func @transform_3(%arg0: i32) -> (i32, i32) {
    %c0_i32 = arith.constant 0 : i32
    %c0_i32_0 = arith.constant 0 : i32
    return %arg0, %c0_i32 : i32, i32
  }
}

</mosaic_0001>

<bundles_post_ra>
// kernel: tpu_custom_call.1
= control target key start
LH: loop header
LB: loop body
LE: loop exit
PB: predicated region body
PF: predicated region fallthrough
CT: control target
= control target key end

     0   :  { %vm31_vm0 = vcmask 1041408   ;;  %v134_v2 = vmov 0.0   ;;  %vm135_vm1 = vmmov 0   ;;  %vm27_vm2 = vcmask 31744   ;;  %s183_s0 = inlined_call_operand.vmem [shape: f32[16,4], index: 0, kind: input, shape index: {}]   ;;  %s184_s1 = inlined_call_operand.vmem [shape: bf16[4,32], index: 1, kind: input, shape index: {}]   ;;  %s185_s2 = inlined_call_operand.vmem [shape: f32[1,32], index: 2, kind: input, shape index: {}]   ;;  %s186_s3 = inlined_call_operand.hbm [shape: f32[16,32], index: 3, kind: output, shape index: {}]  }
   0x1   :  { %v19_v0 = vld [vmem:[%s184_s1] sm:$0x3]  ;;  %99 = vmatprep.subr.bf16.mxu0 %v134_v2  ;;  %101 = vmatprep.mubr.msk.bf16.mxu0 %vm135_vm1, %v134_v2  ;;  %v17_v4 = vld [vmem:[%s183_s0 + $0x8] sm:$0xff] }
   0x2   :  { %v16_v1 = vld [vmem:[%s183_s0] sm:$0xff]  ;;  %v33_v3 = vsel %vm31_vm0, %v19_v0, 0 }
   0x3   :  { %100 = vmatpush3.bf16.msra.mxu0 %v33_v3  ;;  %v18_v5 = vpack.c.bf16 %v17_v4, %v16_v1 }
   0x4   :  { %8 = vsyncpa [#allocation3], 0  ;;  %v95_v6 = vld [vmem:[%s185_s2] ss:$0 sm:$0xff]  ;;  %s136_s19 = smov [#allocation2]   ;;  %vm76_vm3 = vcmask 261120  }
   0x5   :  { %s84_s20 = sshll.u32 %s136_s19, 4  ;;  %s85_s20 = int_to_ptr.vmem [resolvable:$true] %s84_s20 }
   0x6   :  { %102 = vmatmul.mubr.msk.bf16.vlgmr.msra.gmra.mrb[0].mxu0 %vm27_vm2, %v18_v5  ;;  %s110_s0 = scalar_lea.vmem %s85_s20, 256  ;;  %p115_p1 = scmp.lt.s32.totalorder %s85_s20, %s85_s20 }
   0x7   :  { %p111_p0 = scmp.ne.s32.totalorder %s85_s20, %s110_s0  ;;  %p116_p2 = scmp.lt.s32.totalorder %s110_s0, %s110_s0 }
   0x9   :  { %p117_p3 = por %p116_p2, %p115_p1 }
   0xb   :  { %p118_p4 = pnand %p117_p3, %p111_p0 }
  0xd9   :  { %v69_v7 = vpop.f32.mrb[0].mxu0 }
  0xda   :  { %v70_v8 = vadd.f32 %v95_v6, %v69_v7  ;;  %v103_v9 = vpop.f32.mrb[1].mxu0 }
  0xdb   :  { %v72_v10 = vpop.f32.mrb[2].mxu0 }
  0xdc   :  { %77 = vst.msk [vmem:[#allocation2] sm:$0xff] %vm76_vm3, %v70_v8  ;;  %v73_v11 = vadd.f32 %v95_v6, %v72_v10  ;;  %v104_v12 = vpop.f32.mrb[3].mxu0 }
  0xde   :  { %78 = vst.msk [vmem:[#allocation2 + $0x8] sm:$0xff] %vm76_vm3, %v73_v11 }
  0xdf   :  { %121 = shalt.err (!%p118_p4)
}
  0xe0   :  { %s122_s22 = scalar_lea.hbm %s186_s3, 256 }
  0xe1   :  { %p123_p5 = scmp.ne.s32.totalorder %s186_s3, %s122_s22  ;;  %p126_p6 = scmp.lt.u32.totalorder %s122_s22, %s186_s3 }
  0xe3   :  { %p128_p7 = pnand %p126_p6, %p123_p5 }
  0xe5   :  { %131 = shalt.err (!%p128_p7)
}
  0xe6   :  { %s137_s27 = smov 128   ;;  %s138_s28 = smov 8  }
  0xe7   :  { %90 = dma.vmem_to_hbm [thread:$0]  %s85_s20, 256, %s186_s3, [#allocation3], %s137_s27, %s137_s27, %s138_s28  }
  0xe8   :  { %132 = dma.done.wait [#allocation3], 256  }
  0xe9   :  { %133 = vsyncadd [#allocation3], 4294967040 }
  0xea   :  { %94 = vsyncpa [#allocation3], 1 }

</bundles_post_ra>
